<compile_context>
chip_gen: v7x
topology: tpu7x:2x2x1
jax: 0.10.0
libtpu: 0.0.40
codegen_flags: <defaults>
</compile_context>

<pallas_src>
import functools

import jax
import jax.numpy as jnp
import numpy as np
from jax.experimental import pallas as pl
from jax.experimental.pallas import tpu as pltpu

CH = 128          # lane-dense channel-buffer width (>= 97 used channels)
_EPS = 1e-5


# ----------------------------------------------------------------------------
# Tiling helpers
# ----------------------------------------------------------------------------
def _row_tile(H, W):
    """Pick a row tile TH with H % TH == 0 and TH % 8 == 0 (or TH == H)."""
    if H <= 8 or H % 8 != 0:
        return H
    target = max(8, min(128, (4096 // max(W, 1)) // 8 * 8))
    if target >= H:
        return H
    for t in range(target, 7, -8):
        if H % t == 0:
            return t
    return H


def _load_halo_slab(x_hbm, slab, sem, b, row0, TH, H):
    """DMA rows [row0-1, row0+TH] of x_hbm[b] into the (TH+2, W, CH) slab.

    Halo rows are clamped at the image boundary; the kernels mask out the
    out-of-image contributions, so the duplicated rows are never used.
    """
    top = jnp.maximum(row0 - 1, 0)
    bot = jnp.minimum(row0 + TH, H - 1)
    c_main = pltpu.make_async_copy(x_hbm.at[b, pl.ds(row0, TH)],
                                   slab.at[pl.ds(1, TH)], sem.at[0])
    c_top = pltpu.make_async_copy(x_hbm.at[b, pl.ds(top, 1)],
                                  slab.at[pl.ds(0, 1)], sem.at[1])
    c_bot = pltpu.make_async_copy(x_hbm.at[b, pl.ds(bot, 1)],
                                  slab.at[pl.ds(TH + 1, 1)], sem.at[2])
    c_main.start()
    c_top.start()
    c_bot.start()
    c_main.wait()
    c_top.wait()
    c_bot.wait()


# ----------------------------------------------------------------------------
# Fused 3x3 conv (+ optional BN+ReLU prologue) with lane-dense write-through
# ----------------------------------------------------------------------------
def _conv_kernel(x_hbm, w_ref, scale_ref, shift_ref, bias_ref, o_ref, slab, sem,
                 *, TH, H, W, c0, c1, bn_relu):
    b = pl.program_id(0)
    t = pl.program_id(1)
    row0 = t * TH
    _load_halo_slab(x_hbm, slab, sem, b, row0, TH, H)

    xf = slab[...].astype(jnp.float32)                        # (TH+2, W, CH)
    if bn_relu:
        act = jnp.maximum(xf * scale_ref[...] + shift_ref[...], 0.0)
    else:
        act = xf

    wcol = jax.lax.broadcasted_iota(jnp.int32, (TH + 2, W, 1), 1)
    riota = jax.lax.broadcasted_iota(jnp.int32, (TH * W, 1), 0)
    top_ok = row0 > 0
    bot_ok = row0 + TH < H

    acc = jnp.zeros((TH * W, CH), jnp.float32)
    for t_dx in range(3):                       # column tap: offset t_dx - 1
        if t_dx == 1:
            sh = act
        else:
            sh = pltpu.roll(act, shift=(1 - t_dx) % W, axis=1)
            cmask = (wcol >= 1) if t_dx == 0 else (wcol < W - 1)
            sh = jnp.where(cmask, sh, 0.0)
        sh = sh.astype(jnp.bfloat16)
        for t_dy in range(3):                   # row tap: offset t_dy - 1
            tap = sh[t_dy:t_dy + TH].reshape(TH * W, CH)
            if t_dy == 0:
                tap = jnp.where((riota >= W) | top_ok, tap, jnp.zeros_like(tap))
            elif t_dy == 2:
                tap = jnp.where((riota < (TH - 1) * W) | bot_ok, tap,
                                jnp.zeros_like(tap))
            acc = acc + jnp.dot(tap, w_ref[3 * t_dy + t_dx],
                                preferred_element_type=jnp.float32)
    acc = acc + bias_ref[...]

    # Lane-dense write-through: new channels in [c0, c1), old values elsewhere.
    old = slab[pl.ds(1, TH), :, :].reshape(TH * W, CH).astype(jnp.float32)
    ch = jax.lax.broadcasted_iota(jnp.int32, (1, CH), 1)
    out = jnp.where((ch >= c0) & (ch < c1), acc, old)
    o_ref[...] = out.reshape(1, TH, W, CH).astype(o_ref.dtype)


def fused_conv_layer(buf, w9, scale, shift, bias, c0, c1, bn_relu):
    B, H, W, C = buf.shape
    TH = _row_tile(H, W)
    HT = H // TH
    kernel = functools.partial(_conv_kernel, TH=TH, H=H, W=W,
                               c0=c0, c1=c1, bn_relu=bn_relu)
    return pl.pallas_call(
        kernel,
        out_shape=jax.ShapeDtypeStruct((B, H, W, C), jnp.bfloat16),
        grid=(B, HT),
        in_specs=[
            pl.BlockSpec(memory_space=pl.ANY),                     # channel buffer (HBM)
            pl.BlockSpec((9, C, C), lambda b, t: (0, 0, 0)),       # packed weights
            pl.BlockSpec((1, C), lambda b, t: (0, 0)),             # BN scale
            pl.BlockSpec((1, C), lambda b, t: (0, 0)),             # BN shift
            pl.BlockSpec((1, C), lambda b, t: (0, 0)),             # bias
        ],
        out_specs=pl.BlockSpec((1, TH, W, C), lambda b, t: (b, t, 0, 0)),
        scratch_shapes=[pltpu.VMEM((TH + 2, W, C), jnp.bfloat16),
                        pltpu.SemaphoreType.DMA((3,))],
        compiler_params=pltpu.CompilerParams(
            dimension_semantics=("parallel", "arbitrary")),
    )(buf, w9, scale.reshape(1, C), shift.reshape(1, C), bias.reshape(1, C))


# ----------------------------------------------------------------------------
# Final fused kernel: BN+ReLU + 3x3 conv(97->1, bias via constant channel)
#                     + residual tanh/clamp epilogue
# ----------------------------------------------------------------------------
def _final_kernel(x_hbm, wf_ref, scale_ref, shift_ref, img_ref, o_ref, slab, sem,
                  *, TH, H, W):
    b = pl.program_id(0)
    t = pl.program_id(1)
    row0 = t * TH
    _load_halo_slab(x_hbm, slab, sem, b, row0, TH, H)

    xf = slab[...].astype(jnp.float32)
    act = jnp.maximum(xf * scale_ref[...] + shift_ref[...], 0.0)

    wcol = jax.lax.broadcasted_iota(jnp.int32, (TH + 2, W, 1), 1)
    riota = jax.lax.broadcasted_iota(jnp.int32, (TH * W, 1), 0)
    top_ok = row0 > 0
    bot_ok = row0 + TH < H

    res = jnp.zeros((TH, W, 1), jnp.float32)
    for t_dx in range(3):
        if t_dx == 1:
            sh = act
        else:
            sh = pltpu.roll(act, shift=(1 - t_dx) % W, axis=1)
            cmask = (wcol >= 1) if t_dx == 0 else (wcol < W - 1)
            sh = jnp.where(cmask, sh, 0.0)
        for t_dy in range(3):
            tap = sh[t_dy:t_dy + TH]
            if t_dy == 0:
                t2 = jnp.where((riota >= W) | top_ok,
                               tap.reshape(TH * W, CH), 0.0)
                tap = t2.reshape(TH, W, CH)
            elif t_dy == 2:
                t2 = jnp.where((riota < (TH - 1) * W) | bot_ok,
                               tap.reshape(TH * W, CH), 0.0)
                tap = t2.reshape(TH, W, CH)
            res = res + jnp.sum(tap * wf_ref[3 * t_dy + t_dx], axis=-1,
                                keepdims=True)

    img = img_ref[0]                                          # (TH, W, 1)
    o_ref[0] = jnp.clip(img + jnp.tanh(res) * 0.1, 0.0, 1.0)


def fused_final_conv(buf, wf, scale, shift, img_nhwc):
    B, H, W, C = buf.shape
    TH = _row_tile(H, W)
    HT = H // TH
    kernel = functools.partial(_final_kernel, TH=TH, H=H, W=W)
    return pl.pallas_call(
        kernel,
        out_shape=jax.ShapeDtypeStruct((B, H, W, 1), jnp.float32),
        grid=(B, HT),
        in_specs=[
            pl.BlockSpec(memory_space=pl.ANY),                     # channel buffer
            pl.BlockSpec((9, 1, C), lambda b, t: (0, 0, 0)),       # final conv weights
            pl.BlockSpec((1, C), lambda b, t: (0, 0)),             # BN scale
            pl.BlockSpec((1, C), lambda b, t: (0, 0)),             # BN shift
            pl.BlockSpec((1, TH, W, 1), lambda b, t: (b, t, 0, 0)),  # original image
        ],
        out_specs=pl.BlockSpec((1, TH, W, 1), lambda b, t: (b, t, 0, 0)),
        scratch_shapes=[pltpu.VMEM((TH + 2, W, C), jnp.bfloat16),
                        pltpu.SemaphoreType.DMA((3,))],
        compiler_params=pltpu.CompilerParams(
            dimension_semantics=("parallel", "arbitrary")),
    )(buf, wf, scale.reshape(1, C), shift.reshape(1, C), img_nhwc)


# ----------------------------------------------------------------------------
# Message path: small Linear layers + fused separable bilinear resize
# ----------------------------------------------------------------------------
def _linear_kernel(x_ref, w_ref, b_ref, o_ref, *, relu):
    acc = jnp.dot(x_ref[...], w_ref[...],
                  preferred_element_type=jnp.float32) + b_ref[...]
    if relu:
        acc = jnp.maximum(acc, 0.0)
    o_ref[...] = acc


def pallas_linear(x, w, b, relu=False):
    M, K = x.shape
    N = w.shape[1]
    Mp = max(8, ((M + 7) // 8) * 8)            # keep sublane-aligned M tile
    xp = jnp.pad(x.astype(jnp.bfloat16), ((0, Mp - M), (0, 0)))
    out = pl.pallas_call(
        functools.partial(_linear_kernel, relu=relu),
        out_shape=jax.ShapeDtypeStruct((Mp, N), jnp.float32),
        grid=(1,),
        in_specs=[pl.BlockSpec((Mp, K), lambda i: (0, 0)),
                  pl.BlockSpec((K, N), lambda i: (0, 0)),
                  pl.BlockSpec((1, N), lambda i: (0, 0))],
        out_specs=pl.BlockSpec((Mp, N), lambda i: (0, 0)),
    )(xp, w.astype(jnp.bfloat16), b.reshape(1, N).astype(jnp.float32))
    return out[:M]


def _resize_kernel(msg_ref, ah_ref, awt_ref, o_ref):
    m = msg_ref[0]                                            # (64, 64)
    tmp = jnp.dot(ah_ref[...], m, preferred_element_type=jnp.float32)
    o_ref[0] = jnp.dot(tmp, awt_ref[...], preferred_element_type=jnp.float32)


def pallas_bilinear_resize(msg_img, Ah, AwT):
    B = msg_img.shape[0]
    H, W = Ah.shape[0], AwT.shape[1]
    return pl.pallas_call(
        _resize_kernel,
        out_shape=jax.ShapeDtypeStruct((B, H, W), jnp.float32),
        grid=(B,),
        in_specs=[pl.BlockSpec((1, 64, 64), lambda b: (b, 0, 0)),
                  pl.BlockSpec((H, 64), lambda b: (0, 0)),
                  pl.BlockSpec((64, W), lambda b: (0, 0))],
        out_specs=pl.BlockSpec((1, H, W), lambda b: (b, 0, 0)),
        compiler_params=pltpu.CompilerParams(dimension_semantics=("parallel",)),
    )(msg_img.astype(jnp.float32), Ah.astype(jnp.float32),
      AwT.astype(jnp.float32))


def bilinear_matrix(in_size, out_size):
    """1D bilinear interp weights, PyTorch align_corners=False semantics."""
    Wm = np.zeros((out_size, in_size), dtype=np.float32)
    if in_size == out_size:
        np.fill_diagonal(Wm, 1.0)
        return jnp.asarray(Wm)
    scale = in_size / out_size
    for i in range(out_size):
        src = max((i + 0.5) * scale - 0.5, 0.0)
        i0 = min(int(np.floor(src)), in_size - 1)
        i1 = min(i0 + 1, in_size - 1)
        lam = min(max(src - i0, 0.0), 1.0)
        Wm[i, i0] += 1.0 - lam
        Wm[i, i1] += lam
    return jnp.asarray(Wm)


# ----------------------------------------------------------------------------
# Parameter packing helpers
# ----------------------------------------------------------------------------
def _pack_conv_w(w, cin, c0, cout):
    """(3,3,cin,cout) -> (9, CH, CH) bf16 with the output slot at lanes [c0, c0+cout)."""
    w9 = jnp.zeros((9, CH, CH), jnp.float32)
    w9 = w9.at[:, :cin, c0:c0 + cout].set(w.reshape(9, cin, cout))
    return w9.astype(jnp.bfloat16)


def _bn_scale_shift(bn, cin):
    scale = bn["gamma"] / jnp.sqrt(bn["var"] + _EPS)
    shift = bn["beta"] - bn["mean"] * scale
    return (jnp.pad(scale, (0, CH - cin)).astype(jnp.float32),
            jnp.pad(shift, (0, CH - cin)).astype(jnp.float32))


# ----------------------------------------------------------------------------
# Parameter init (deterministic, mirrors module __init__ shapes)
# ----------------------------------------------------------------------------
def _kaiming_conv(key, cin, cout):
    std = (2.0 / (cout * 9)) ** 0.5              # kaiming_normal, fan_out, relu
    return jax.random.normal(key, (3, 3, cin, cout), jnp.float32) * std


def _bn_params(c):
    return dict(gamma=jnp.ones((c,), jnp.float32), beta=jnp.zeros((c,), jnp.float32),
                mean=jnp.zeros((c,), jnp.float32), var=jnp.ones((c,), jnp.float32))


def init_params(key, image_channels=1, growth_rate=16, num_dense_layers=4):
    ks = iter(jax.random.split(key, 8))
    p = {}
    p["conv1_w"] = _kaiming_conv(next(ks), image_channels, 32)
    p["conv1_b"] = jnp.zeros((32,), jnp.float32)
    p["prep_w"] = jax.random.normal(next(ks), (256, 256), jnp.float32) * 0.01
    p["prep_b"] = jnp.zeros((256,), jnp.float32)
    p["embed_w"] = jax.random.normal(next(ks), (256, 64 * 64), jnp.float32) * 0.01
    p["embed_b"] = jnp.zeros((64 * 64,), jnp.float32)
    dense = []
    c = 32 + 1
    for _ in range(num_dense_layers):
        dense.append(dict(bn=_bn_params(c), conv_w=_kaiming_conv(next(ks), c, growth_rate)))
        c += growth_rate
    p["dense"] = dense
    p["final_bn"] = _bn_params(c)
    p["final_conv_w"] = _kaiming_conv(next(ks), c, image_channels)
    p["final_conv_b"] = jnp.zeros((image_channels,), jnp.float32)
    return p


# ----------------------------------------------------------------------------
# Forward pass (matches SteganographyEncoder.forward with feature_weights=None)
# ----------------------------------------------------------------------------
def steganography_encoder_forward(params, image, message):
    B, C_img, H, W = image.shape
    assert C_img == 1  # TODO(synk): multi-channel images not modeled
    img_hw = image[:, 0].astype(jnp.float32)                    # (B, H, W)
    img_nhwc = jnp.transpose(image, (0, 2, 3, 1)).astype(jnp.float32)  # (B, H, W, 1)

    # message path: Linear+ReLU, Linear, view (64,64), bilinear resize -> (H, W)
    msg = pallas_linear(message.astype(jnp.float32),
                        params["prep_w"], params["prep_b"], relu=True)
    msg = pallas_linear(msg, params["embed_w"], params["embed_b"], relu=False)
    msg_img = msg.reshape(B, 64, 64)
    Ah = bilinear_matrix(64, H)                                  # (H, 64)
    Aw = bilinear_matrix(64, W)                                  # (W, 64)
    msg_sp = pallas_bilinear_resize(msg_img, Ah, jnp.transpose(Aw))  # (B, H, W)

    # 128-wide lane-dense channel buffer:
    #   ch0 = image (conv1 input), ch32 = message plane, ch127 = constant 1.0
    buf = jnp.zeros((B, H, W, CH), jnp.float32)
    buf = buf.at[..., 0].set(img_hw)
    buf = buf.at[..., 32].set(msg_sp)
    buf = buf.at[..., CH - 1].set(1.0)
    buf = buf.astype(jnp.bfloat16)

    ones = jnp.ones((CH,), jnp.float32)
    zeros = jnp.zeros((CH,), jnp.float32)

    # conv1 -> channels [0, 32), with bias, no BN/ReLU prologue
    w9 = _pack_conv_w(params["conv1_w"], cin=1, c0=0, cout=32)
    bias1 = zeros.at[:32].set(params["conv1_b"])
    buf = fused_conv_layer(buf, w9, ones, zeros, bias1, c0=0, c1=32, bn_relu=False)

    # dense layers: BN+ReLU prologue fused, output appended at channel slot
    cin = 33
    for layer in params["dense"]:
        scale, shift = _bn_scale_shift(layer["bn"], cin)
        w9 = _pack_conv_w(layer["conv_w"], cin=cin, c0=cin, cout=16)
        buf = fused_conv_layer(buf, w9, scale, shift, zeros,
                               c0=cin, c1=cin + 16, bn_relu=True)
        cin += 16

    # final BN+ReLU + conv(97->1) + bias (via constant channel) + tanh residual clamp
    scale, shift = _bn_scale_shift(params["final_bn"], cin)
    scale = scale.at[CH - 1].set(1.0)          # keep the constant-1 bias channel alive
    wf = jnp.zeros((9, CH), jnp.float32)
    wf = wf.at[:, :cin].set(params["final_conv_w"].reshape(9, cin))
    wf = wf.at[4, CH - 1].set(params["final_conv_b"][0])   # center tap * 1.0 = bias
    wf = wf.reshape(9, 1, CH)

    stego = fused_final_conv(buf, wf, scale, shift, img_nhwc)    # (B, H, W, 1)
    return jnp.transpose(stego, (0, 3, 1, 2))                    # (B, 1, H, W)


if __name__ == "__main__":
    key = jax.random.PRNGKey(0)
    k_img, k_msg, k_par = jax.random.split(key, 3)
    image = jax.random.uniform(k_img, (2, 1, 16, 16), jnp.float32)   # NCHW in [0, 1]
    message = jax.random.bernoulli(k_msg, 0.5, (2, 256)).astype(jnp.float32)
    params = init_params(k_par)

    stego = steganography_encoder_forward(params, image, message)
    stego = jax.block_until_ready(stego)
    assert stego.shape == image.shape and stego.dtype == jnp.float32
    assert bool(jnp.all(jnp.isfinite(stego)))
    print("KERNEL_OK")
</pallas_src>

<mosaic_0001>
module attributes {stable_mosaic.version = 11 : i64} {
  func.func @_linear_kernel(%arg0: i32, %arg1: memref<8x256xbf16, #tpu.memory_space<vmem>>, %arg2: memref<256x256xbf16, #tpu.memory_space<vmem>>, %arg3: memref<1x256xf32, #tpu.memory_space<vmem>>, %arg4: memref<8x256xf32, #tpu.memory_space<vmem>>) attributes {dimension_semantics = [#tpu.dimension_semantics<arbitrary>], iteration_bounds = array<i64: 1>, scalar_prefetch = 0 : i64, scratch_operands = 0 : i64, tpu.core_type = #tpu.core_type<tc>, window_params = [{pipeline_mode = #tpu.pipeline_mode<synchronous>, transform_indices = @transform_0, window_bounds = array<i64: 8, 256>}, {pipeline_mode = #tpu.pipeline_mode<synchronous>, transform_indices = @transform_1, window_bounds = array<i64: 256, 256>}, {pipeline_mode = #tpu.pipeline_mode<synchronous>, transform_indices = @transform_2, window_bounds = array<i64: 1, 256>}, {pipeline_mode = #tpu.pipeline_mode<synchronous>, transform_indices = @transform_3, window_bounds = array<i64: 8, 256>}]} {
    %c0 = arith.constant 0 : index
    %c0_0 = arith.constant 0 : index
    %0 = vector.load %arg1[%c0, %c0_0] : memref<8x256xbf16, #tpu.memory_space<vmem>>, vector<8x256xbf16>
    %c0_1 = arith.constant 0 : index
    %c0_2 = arith.constant 0 : index
    %1 = vector.load %arg2[%c0_1, %c0_2] : memref<256x256xbf16, #tpu.memory_space<vmem>>, vector<256x256xbf16>
    %cst = arith.constant dense<0.000000e+00> : vector<8x256xf32>
    %2 = tpu.matmul %0, %1, %cst {dimension_numbers = #tpu.dot_dimension_numbers<[1], [0], [0], [1], [0, 0, 1, 1], [], []>} : vector<8x256xbf16>, vector<256x256xbf16>, vector<8x256xf32> -> vector<8x256xf32>
    %c0_3 = arith.constant 0 : index
    %c0_4 = arith.constant 0 : index
    %3 = vector.load %arg3[%c0_3, %c0_4] : memref<1x256xf32, #tpu.memory_space<vmem>>, vector<1x256xf32>
    %4 = vector.broadcast %3 : vector<1x256xf32> to vector<8x256xf32>
    %5 = arith.addf %2, %4 : vector<8x256xf32>
    %cst_5 = arith.constant 0.000000e+00 : f32
    %6 = vector.broadcast %cst_5 : f32 to vector<8x256xf32>
    %7 = arith.maximumf %5, %6 : vector<8x256xf32>
    %c0_6 = arith.constant 0 : index
    %c0_7 = arith.constant 0 : index
    %8 = vector.load %arg4[%c0_6, %c0_7] : memref<8x256xf32, #tpu.memory_space<vmem>>, vector<8x256xf32>
    tpu.vector_store %arg4[%c0_6, %c0_7], %7 {strides = array<i32>} : memref<8x256xf32, #tpu.memory_space<vmem>>, vector<8x256xf32>,
    return
  }
  func.func @transform_0(%arg0: i32) -> (i32, i32) {
    %c0_i32 = arith.constant 0 : i32
    %c0_i32_0 = arith.constant 0 : i32
    %c0_i32_1 = arith.constant 0 : i32
    return %c0_i32, %c0_i32_0 : i32, i32
  }
  func.func @transform_1(%arg0: i32) -> (i32, i32) {
    %c0_i32 = arith.constant 0 : i32
    %c0_i32_0 = arith.constant 0 : i32
    %c0_i32_1 = arith.constant 0 : i32
    return %c0_i32, %c0_i32_0 : i32, i32
  }
  func.func @transform_2(%arg0: i32) -> (i32, i32) {
    %c0_i32 = arith.constant 0 : i32
    %c0_i32_0 = arith.constant 0 : i32
    %c0_i32_1 = arith.constant 0 : i32
    return %c0_i32, %c0_i32_0 : i32, i32
  }
  func.func @transform_3(%arg0: i32) -> (i32, i32) {
    %c0_i32 = arith.constant 0 : i32
    %c0_i32_0 = arith.constant 0 : i32
    %c0_i32_1 = arith.constant 0 : i32
    return %c0_i32, %c0_i32_0 : i32, i32
  }
}

</mosaic_0001>

<bundles_post_ra>
// kernel: tpu_custom_call.1
= control target key start
LH: loop header
LB: loop body
LE: loop exit
PB: predicated region body
PF: predicated region fallthrough
CT: control target
= control target key end

     0   :  { %8 = vsyncpa [#allocation3], 0  ;;  %s546_s0 = inlined_call_operand.hbm [shape: bf16[8,256], index: 0, kind: input, shape index: {}]   ;;  %s547_s1 = inlined_call_operand.hbm [shape: bf16[256,256], index: 1, kind: input, shape index: {}]   ;;  %s548_s2 = inlined_call_operand.vmem [shape: f32[1,256], index: 2, kind: input, shape index: {}]   ;;  %s549_s3 = inlined_call_operand.hbm [shape: f32[8,256], index: 3, kind: output, shape index: {}]  }
   0x1   :  { %9 = vsyncpa [#allocation6], 0 }
   0x2   :  { %10 = vsyncpa [#allocation4], 0  ;;  %s475_s12 = smov [#allocation2]   ;;  %s476_s14 = smov [#allocation5]  }
   0x3   :  { %s17_s13 = sshll.u32 %s475_s12, 4  ;;  %s26_s15 = sshll.u32 %s476_s14, 4  ;;  %s18_s13 = int_to_ptr.vmem [resolvable:$true] %s17_s13  ;;  %s500_s15 = int_to_ptr.vmem [resolvable:$true] %s26_s15 }
   0x4   :  { %s403_s18 = scalar_lea.hbm %s546_s0, 128 }
   0x5   :  { %p404_p0 = scmp.ne.s32.totalorder %s546_s0, %s403_s18  ;;  %p407_p1 = scmp.lt.u32.totalorder %s403_s18, %s546_s0 }
   0x7   :  { %p409_p2 = pnand %p407_p1, %p404_p0 }
   0x9   :  { %412 = shalt.err (!%p409_p2)
}
   0xa   :  { %s413_s23 = scalar_lea.vmem %s18_s13, 128  ;;  %p418_p4 = scmp.lt.s32.totalorder %s18_s13, %s18_s13 }
   0xb   :  { %p414_p3 = scmp.ne.s32.totalorder %s18_s13, %s413_s23  ;;  %p419_p5 = scmp.lt.s32.totalorder %s413_s23, %s413_s23 }
   0xd   :  { %p420_p6 = por %p419_p5, %p418_p4 }
   0xf   :  { %p421_p7 = pnand %p420_p6, %p414_p3 }
  0x11   :  { %424 = shalt.err (!%p421_p7)
}
  0x12   :  { %20 = dma.hbm_to_vmem [thread:$0]  %s546_s0, 128, %s18_s13, [#allocation3]  }
  0x13   :  { %s425_s28 = scalar_lea.hbm %s547_s1, 4096 }
  0x14   :  { %p426_p8 = scmp.ne.s32.totalorder %s547_s1, %s425_s28  ;;  %p429_p9 = scmp.lt.u32.totalorder %s425_s28, %s547_s1 }
  0x16   :  { %p431_p10 = pnand %p429_p9, %p426_p8 }
  0x18   :  { %434 = shalt.err (!%p431_p10)
}
  0x19   :  { %s435_s6 = scalar_lea.vmem %s500_s15, 4096  ;;  %p440_p12 = scmp.lt.s32.totalorder %s500_s15, %s500_s15 }
  0x1a   :  { %p436_p11 = scmp.ne.s32.totalorder %s500_s15, %s435_s6  ;;  %p441_p13 = scmp.lt.s32.totalorder %s435_s6, %s435_s6 }
  0x1c   :  { %p442_p0 = por %p441_p13, %p440_p12 }
  0x1e   :  { %p443_p1 = pnand %p442_p0, %p436_p11 }
  0x20   :  { %446 = shalt.err (!%p443_p1)
}
  0x21   :  { %s477_s0 = smov 128   ;;  %s478_s7 = smov 8  }
  0x22   :  { %32 = dma.hbm_to_vmem [thread:$0]  %s547_s1, 4096, %s500_s15, [#allocation6], %s477_s0, %s477_s0, %s478_s7  }
  0x23   :  { %469 = dma.done.wait [#allocation3], 128  }
  0x24   :  { %470 = vsyncadd [#allocation3], 4294967168 }
  0x25   :  { %471 = dma.done.wait [#allocation6], 4096  }
  0x26   :  { %472 = vsyncadd [#allocation6], 4294963200  ;;  %v353_v0 = vld [vmem:[#allocation5 + $0x4] ss:$8 sps:$4 sm:$0xff]   ;;  %v355_v1 = vld [vmem:[#allocation5] ss:$8 sps:$4 sm:$0xff]   ;;  %v76_v35 = vlaneseq }
  0x27   :  { %253 = vmatprep.subr.bf16.mxu0 %v353_v0  ;;  %v356_v2 = vld [vmem:[#allocation5 + $0x14] ss:$8 sps:$4 sm:$0xff]   ;;  %v358_v3 = vld [vmem:[#allocation5 + $0x10] ss:$8 sps:$4 sm:$0xff]   ;;  %v359_v4 = vld [vmem:[#allocation5 + $0x24] ss:$8 sps:$4 sm:$0xff]  }
  0x28   :  { %254 = vmatpush1.bf16.msra.mxu0 %v355_v1  ;;  %v361_v5 = vld [vmem:[#allocation5 + $0x20] ss:$8 sps:$4 sm:$0xff]   ;;  %v362_v6 = vld [vmem:[#allocation5 + $0x34] ss:$8 sps:$4 sm:$0xff]   ;;  %v364_v7 = vld [vmem:[#allocation5 + $0x30] ss:$8 sps:$4 sm:$0xff]  }
  0x29   :  { %255 = vmatprep.subr.bf16.mxu0 %v356_v2  ;;  %v365_v8 = vld [vmem:[#allocation5 + $0x44] ss:$8 sps:$4 sm:$0xff]   ;;  %v367_v9 = vld [vmem:[#allocation5 + $0x40] ss:$8 sps:$4 sm:$0xff]   ;;  %v368_v10 = vld [vmem:[#allocation5 + $0x54] ss:$8 sps:$4 sm:$0xff]  }
  0x2a   :  { %v370_v11 = vld [vmem:[#allocation5 + $0x50] ss:$8 sps:$4 sm:$0xff]   ;;  %v371_v12 = vld [vmem:[#allocation5 + $0x64] ss:$8 sps:$4 sm:$0xff]   ;;  %v373_v15 = vld [vmem:[#allocation5 + $0x60] ss:$8 sps:$4 sm:$0xff]  }
  0x2b   :  { %v41_v13 = vld [vmem:[#allocation2] sm:$0xff]  ;;  %v377_v18 = vld [vmem:[#allocation5 + $0x84] ss:$8 sps:$4 sm:$0xff]   ;;  %v379_v19 = vld [vmem:[#allocation5 + $0x80] ss:$8 sps:$4 sm:$0xff]   ;;  %v77_v36 = vshrl.u32 %v76_v35, 7 }
  0x2c   :  { %256 = vmatpush1.bf16.msra.mxu0 %v358_v3  ;;  %v315_v14 = vcombine.high %v41_v13, %v41_v13  ;;  %v374_v16 = vld [vmem:[#allocation5 + $0x74] ss:$8 sps:$4 sm:$0xff]   ;;  %v376_v17 = vld [vmem:[#allocation5 + $0x70] ss:$8 sps:$4 sm:$0xff]   ;;  %v383_v22 = vld [vmem:[#allocation5 + $0xa4] ss:$8 sps:$4 sm:$0xff]   ;;  %v314_v34 = vcombine.low %v41_v13, %v41_v13 }
  0x2d   :  { %257 = vmatprep.subr.bf16.mxu0 %v359_v4  ;;  %v380_v20 = vld [vmem:[#allocation5 + $0x94] ss:$8 sps:$4 sm:$0xff]   ;;  %v382_v21 = vld [vmem:[#allocation5 + $0x90] ss:$8 sps:$4 sm:$0xff]   ;;  %v385_v23 = vld [vmem:[#allocation5 + $0xa0] ss:$8 sps:$4 sm:$0xff]  }
  0x2e   :  { %285 = vmatprep.mubr.bf16.mxu0 %v315_v14  ;;  %v386_v24 = vld [vmem:[#allocation5 + $0xb4] ss:$8 sps:$4 sm:$0xff]   ;;  %v388_v25 = vld [vmem:[#allocation5 + $0xb0] ss:$8 sps:$4 sm:$0xff]   ;;  %v389_v26 = vld [vmem:[#allocation5 + $0xc4] ss:$8 sps:$4 sm:$0xff]  }
  0x2f   :  { %v391_v27 = vld [vmem:[#allocation5 + $0xc0] ss:$8 sps:$4 sm:$0xff]   ;;  %v392_v28 = vld [vmem:[#allocation5 + $0xd4] ss:$8 sps:$4 sm:$0xff]   ;;  %v394_v29 = vld [vmem:[#allocation5 + $0xd0] ss:$8 sps:$4 sm:$0xff]  }
  0x30   :  { %258 = vmatpush1.bf16.msra.mxu0 %v361_v5  ;;  %v395_v30 = vld [vmem:[#allocation5 + $0xe4] ss:$8 sps:$4 sm:$0xff]   ;;  %v397_v31 = vld [vmem:[#allocation5 + $0xe0] ss:$8 sps:$4 sm:$0xff]   ;;  %v398_v32 = vld [vmem:[#allocation5 + $0xf4] ss:$8 sps:$4 sm:$0xff]  }
  0x31   :  { %259 = vmatprep.subr.bf16.mxu0 %v362_v6  ;;  %v400_v33 = vld [vmem:[#allocation5 + $0xf0] ss:$8 sps:$4 sm:$0xff]   ;;  %v78_v37 = vsub.s32 0, %v77_v36  ;;  %v82_v39 = vsub.s32 1, %v77_v36  ;;  %s479_s11 = smov [#allocation7]  }
  0x32   :  { %v74_v38 = vld [vmem:[%s548_s2] sm:$0x3]  ;;  %s304_s12 = sshll.u32 %s479_s11, 4  ;;  %s305_s12 = int_to_ptr.vmem [resolvable:$true] %s304_s12 }
  0x33   :  { %v79_v40 = vrot.slane %v74_v38, %v78_v37  ;;  %v83_v41 = vrot.slane %v74_v38, %v82_v39  ;;  %s447_s13 = scalar_lea.vmem %s305_s12, 256  ;;  %p452_p3 = scmp.lt.s32.totalorder %s305_s12, %s305_s12 }
  0x34   :  { %260 = vmatpush1.bf16.msra.mxu0 %v364_v7  ;;  %p448_p2 = scmp.ne.s32.totalorder %s305_s12, %s447_s13  ;;  %p453_p4 = scmp.lt.s32.totalorder %s447_s13, %s447_s13 }
  0x35   :  { %261 = vmatprep.subr.bf16.mxu0 %v365_v8 }
  0x36   :  { %p454_p5 = por %p453_p4, %p452_p3 }
  0x38   :  { %262 = vmatpush1.bf16.msra.mxu0 %v367_v9  ;;  %p455_p6 = pnand %p454_p5, %p448_p2 }
  0x39   :  { %263 = vmatprep.subr.bf16.mxu0 %v368_v10 }
  0x3c   :  { %264 = vmatpush1.bf16.msra.mxu0 %v370_v11 }
  0x3d   :  { %265 = vmatprep.subr.bf16.mxu0 %v371_v12 }
  0x40   :  { %266 = vmatpush1.bf16.msra.mxu0 %v373_v15 }
  0x41   :  { %267 = vmatprep.subr.bf16.mxu0 %v374_v16 }
  0x44   :  { %268 = vmatpush1.bf16.msra.mxu0 %v376_v17 }
  0x45   :  { %269 = vmatprep.subr.bf16.mxu0 %v377_v18 }
  0x48   :  { %270 = vmatpush1.bf16.msra.mxu0 %v379_v19 }
  0x49   :  { %271 = vmatprep.subr.bf16.mxu0 %v380_v20 }
  0x4c   :  { %272 = vmatpush1.bf16.msra.mxu0 %v382_v21 }
  0x4d   :  { %273 = vmatprep.subr.bf16.mxu0 %v383_v22 }
  0x50   :  { %274 = vmatpush1.bf16.msra.mxu0 %v385_v23 }
  0x51   :  { %275 = vmatprep.subr.bf16.mxu0 %v386_v24 }
  0x54   :  { %276 = vmatpush1.bf16.msra.mxu0 %v388_v25 }
  0x55   :  { %277 = vmatprep.subr.bf16.mxu0 %v389_v26 }
  0x58   :  { %278 = vmatpush1.bf16.msra.mxu0 %v391_v27 }
  0x59   :  { %279 = vmatprep.subr.bf16.mxu0 %v392_v28 }
  0x5c   :  { %280 = vmatpush1.bf16.msra.mxu0 %v394_v29 }
  0x5d   :  { %281 = vmatprep.subr.bf16.mxu0 %v395_v30 }
  0x60   :  { %282 = vmatpush1.bf16.msra.mxu0 %v397_v31 }
  0x61   :  { %283 = vmatprep.subr.bf16.mxu0 %v398_v32 }
  0x64   :  { %284 = vmatpush1.bf16.msra.mxu0 %v400_v33 }
  0x67   :  { %286 = vmatmul.mubr.bf16.vlgmr.msra.gmra.mrb[0].mxu0 %v314_v34 }
 0x13a   :  { %v287_v42 = vpop.f32.mrb[0].mxu0 }
 0x13b   :  { %v288_v43 = vadd.f32 %v287_v42, %v79_v40  ;;  %v289_v44 = vpop.f32.mrb[1].mxu0 }
 0x13c   :  { %v290_v45 = vadd.f32 %v289_v44, %v83_v41  ;;  %v291_v46 = vpop.f32.mrb[2].mxu0 }
 0x13d   :  { %v294_v47 = vmax.f32 %v288_v43, 0.0  ;;  %v292_v48 = vpop.f32.mrb[3].mxu0 }
 0x13e   :  { %v295_v49 = vmax.f32 %v290_v45, 0.0 }
 0x13f   :  { %296 = vst [vmem:[#allocation7] sm:$0xff] %v294_v47 }
 0x140   :  { %297 = vst [vmem:[#allocation7 + $0x8] sm:$0xff] %v295_v49 }
 0x141   :  { %458 = shalt.err (!%p455_p6)
}
 0x142   :  { %s459_s15 = scalar_lea.hbm %s549_s3, 256 }
 0x143   :  { %p460_p7 = scmp.ne.s32.totalorder %s549_s3, %s459_s15  ;;  %p463_p8 = scmp.lt.u32.totalorder %s459_s15, %s549_s3 }
 0x145   :  { %p465_p9 = pnand %p463_p8, %p460_p7 }
 0x147   :  { %468 = shalt.err (!%p465_p9)
}
 0x148   :  { %307 = dma.vmem_to_hbm [thread:$0]  %s305_s12, 256, %s549_s3, [#allocation4]  }
 0x149   :  { %473 = dma.done.wait [#allocation4], 256  }
 0x14a   :  { %474 = vsyncadd [#allocation4], 4294967040 }
 0x14b   :  { %311 = vsyncpa [#allocation3], 1 }
 0x14c   :  { %312 = vsyncpa [#allocation6], 1 }
 0x14d   :  { %313 = vsyncpa [#allocation4], 1 }

</bundles_post_ra>
